<compile_context>
chip_gen: v5e
topology: v5e:2x2
jax: 0.10.0
libtpu: 0.0.40
codegen_flags: <defaults>
</compile_context>

<pallas_src>
import functools
import math

import jax
import jax.numpy as jnp
from jax.experimental import pallas as pl
from jax.experimental.pallas import tpu as pltpu


def _round_up(x, m):
    return ((x + m - 1) // m) * m


def _time_cond_kernel(time_ref, y_ref, slab_ref, wblk_ref, bblk_ref,
                      t_ref, blk_ref, *, dimp, half, y_dim, time_dim, neg_scale):
    """Fused sinusoidal embed -> Linear -> SiLU -> Linear (+ y_linear) -> GELU -> per-block Linear."""
    # --- static row offsets into the packed bf16 slab (16-row aligned slices) ---
    r_wy = dimp
    r_w2 = dimp + 16
    r_b = dimp + 16 + time_dim

    # --- sinusoidal embedding across all `dimp` lanes in ONE vreg (VPU/EUP) ---
    lane = jax.lax.broadcasted_iota(jnp.int32, (1, dimp), 1)
    lane_mod = jnp.where(lane < half, lane, lane - half).astype(jnp.float32)
    freqs = jnp.exp(lane_mod * neg_scale)                     # (1, dimp)
    emb = time_ref[...] * freqs                               # (B, dimp)
    sincos = jnp.where(lane < half, jnp.sin(emb), jnp.cos(emb))

    # --- unpack weight slab (static, tile-aligned ref slices; upcast bf16 -> f32) ---
    w1 = slab_ref[0:dimp, :].astype(jnp.float32)              # (dimp, 128), pad rows are 0
    wy = slab_ref[r_wy:r_wy + 16, :].astype(jnp.float32)      # (16, 128), rows >= y_dim are 0
    w2 = slab_ref[r_w2:r_w2 + time_dim, :].astype(jnp.float32)
    bias = slab_ref[r_b:r_b + 16, :].astype(jnp.float32)
    b1 = bias[0:1, :]                                         # (1, 128)
    b_comb = bias[1:2, :]                                     # (1, 128)  == b2 + by

    hp = jax.lax.Precision.HIGHEST                            # MXU is idle here -> free
    h = jnp.dot(sincos, w1, preferred_element_type=jnp.float32, precision=hp) + b1
    h = h * (1.0 / (1.0 + jnp.exp(-h)))                       # SiLU
    t = jnp.dot(h, w2, preferred_element_type=jnp.float32, precision=hp) + b_comb

    # --- y_linear(y): y_dim is tiny (<=16) -> a handful of VPU madds, no MXU/K-alignment ---
    yv = y_ref[...]                                           # (B, y_dim)
    for j in range(y_dim):
        t = t + yv[:, j:j + 1] * wy[j:j + 1, :]

    t_ref[...] = t                                            # (B, 128) lane-dense store

    # --- GELU (exact: erf via Abramowitz-Stegun 7.1.26, max |err| ~1.5e-7) ---
    z = t * (1.0 / math.sqrt(2.0))
    az = jnp.abs(z)
    u = 1.0 / (1.0 + 0.3275911 * az)
    poly = u * (0.254829592 + u * (-0.284496736 + u * (1.421413741
               + u * (-1.453152027 + u * 1.061405429))))
    e = 1.0 - poly * jnp.exp(-az * az)
    erf = jnp.where(z >= 0.0, e, -e)
    g = 0.5 * t * (1.0 + erf)

    # --- all per-ConvNextBlock time projections as one bf16 MXU matmul ---
    blk = jnp.dot(g.astype(jnp.bfloat16), wblk_ref[...],
                  preferred_element_type=jnp.float32) + bblk_ref[...]
    blk_ref[...] = blk                                        # (B, sum_C_pad) lane-dense store


def pack_unet_time_params(w1, b1, w2, b2, wy, by, blk_ws, blk_bs):
    """ONE-TIME packing of every constant in the time-conditioning path.

    Do this at parameter-init time, NOT per forward call.  Weights are given in
    (in_features, out_features) orientation, i.e. out = x @ W + b (transpose of
    the raw torch nn.Linear.weight).  blk_ws[i]/blk_bs[i] is ConvNextBlock_i's
    time projection nn.Linear(time_dim, C_i): shape (time_dim, C_i) / (C_i,).
    """
    dim, time_dim = w1.shape
    assert dim % 2 == 0 and dim >= 4, "dim must be even and >= 4"
    assert time_dim % 128 == 0, "time_dim must be lane-dense (multiple of 128)"
    half = dim // 2
    y_dim = wy.shape[0]
    assert 1 <= y_dim <= 16, "y_dim > 16 needs a larger wy section"
    dimp = _round_up(dim, 16)                     # bf16 sublane tile = 16 rows

    f32 = jnp.float32
    w1p = jnp.zeros((dimp, time_dim), f32).at[:dim].set(w1.astype(f32))
    wyp = jnp.zeros((16, time_dim), f32).at[:y_dim].set(wy.astype(f32))
    biasp = jnp.zeros((16, time_dim), f32)
    biasp = biasp.at[0].set(b1.astype(f32))
    biasp = biasp.at[1].set(b2.astype(f32) + by.astype(f32))   # fold b2 + by once
    slab = jnp.concatenate([w1p, wyp, w2.astype(f32), biasp], axis=0).astype(jnp.bfloat16)

    blk_dims = tuple(int(w.shape[1]) for w in blk_ws)
    sum_c = sum(blk_dims)
    sum_c_pad = _round_up(max(sum_c, 128), 128)   # keep stores unmasked on v5e
    wblk = jnp.zeros((time_dim, sum_c_pad), f32)
    bblk = jnp.zeros((1, sum_c_pad), f32)
    offsets = []
    off = 0
    for w, b in zip(blk_ws, blk_bs):
        c = int(w.shape[1])
        wblk = wblk.at[:, off:off + c].set(w.astype(f32))
        bblk = bblk.at[0, off:off + c].set(b.astype(f32))
        offsets.append(off)
        off += c
    wblk = wblk.astype(jnp.bfloat16)

    meta = dict(dim=dim, dimp=dimp, half=half, y_dim=y_dim, time_dim=time_dim,
                neg_scale=-(math.log(10000.0) / (half - 1)),
                blk_dims=blk_dims, blk_offsets=tuple(offsets), sum_c_pad=sum_c_pad)
    return dict(slab=slab, wblk=wblk, bblk=bblk, meta=meta)


def unet_time_conditioning(time, y, packed):
    """Per-step forward: t = y_linear(y) + TimeEmbed(time); c_i = ConvNextBlock_i.mlp(t).

    Returns (t, blk): t is (B, time_dim); blk[:, off_i:off_i+C_i] is block i's
    GELU->Linear time projection (padding lanes are zero).
    """
    meta = packed["meta"]
    b_sz = time.shape[0]
    time_col = jnp.asarray(time, jnp.float32).reshape(b_sz, 1)
    y_f = jnp.asarray(y, jnp.float32)

    kernel = functools.partial(
        _time_cond_kernel, dimp=meta["dimp"], half=meta["half"],
        y_dim=meta["y_dim"], time_dim=meta["time_dim"], neg_scale=meta["neg_scale"])

    vmem = pl.BlockSpec(memory_space=pltpu.MemorySpace.VMEM)   # whole array, one DMA each
    return pl.pallas_call(
        kernel,
        out_shape=(jax.ShapeDtypeStruct((b_sz, meta["time_dim"]), jnp.float32),
                   jax.ShapeDtypeStruct((b_sz, meta["sum_c_pad"]), jnp.float32)),
        in_specs=[vmem, vmem, vmem, vmem, vmem],
        out_specs=(vmem, vmem),
    )(time_col, y_f, packed["slab"], packed["wblk"], packed["bblk"])


def _reference(time, y, w1, b1, w2, b2, wy, by, blk_ws, blk_bs):
    """Pure-JAX mirror of the PyTorch forward path (f32, HIGHEST precision)."""
    dim = w1.shape[0]
    half = dim // 2
    scale = math.log(10000.0) / (half - 1)
    freqs = jnp.exp(jnp.arange(half, dtype=jnp.float32) * -scale)
    emb = time.astype(jnp.float32)[:, None] * freqs[None, :]
    sincos = jnp.concatenate((jnp.sin(emb), jnp.cos(emb)), axis=-1)
    hp = jax.lax.Precision.HIGHEST
    h = jnp.dot(sincos, w1, precision=hp) + b1
    h = h * (1.0 / (1.0 + jnp.exp(-h)))
    t = jnp.dot(h, w2, precision=hp) + b2
    t = t + jnp.dot(y.astype(jnp.float32), wy, precision=hp) + by
    g = jax.nn.gelu(t, approximate=False)
    blks = [jnp.dot(g, wb, precision=hp) + bb for wb, bb in zip(blk_ws, blk_bs)]
    return t, blks


if __name__ == "__main__":
    key = jax.random.PRNGKey(0)
    dim = 32                    # Unet base dim
    time_dim = dim * 4          # 128 -> lane-dense
    y_dim = 9                   # condition == 'odt_all'
    batch = 8

    # Per-ConvNextBlock time-projection widths for a small Unet
    # (dim=32, dim_mults=(1, 2), init_dim = dim//3*2 = 21):
    #   downs: [21, 32, 32, 64], mid: [64, 64], ups: [128, 32]
    blk_dims = (21, 32, 32, 64, 64, 64, 128, 32)

    keys = iter(jax.random.split(key, 8 + 2 * len(blk_dims)))
    time = jax.random.randint(next(keys), (batch,), 0, 1000).astype(jnp.float32)
    y = jax.random.normal(next(keys), (batch, y_dim), jnp.float32)
    w1 = jax.random.normal(next(keys), (dim, time_dim), jnp.float32) / math.sqrt(dim)
    b1 = 0.1 * jax.random.normal(next(keys), (time_dim,), jnp.float32)
    w2 = jax.random.normal(next(keys), (time_dim, time_dim), jnp.float32) / math.sqrt(time_dim)
    b2 = 0.1 * jax.random.normal(next(keys), (time_dim,), jnp.float32)
    wy = jax.random.normal(next(keys), (y_dim, time_dim), jnp.float32) / math.sqrt(y_dim)
    by = 0.1 * jax.random.normal(next(keys), (time_dim,), jnp.float32)
    blk_ws = [jax.random.normal(next(keys), (time_dim, c), jnp.float32) / math.sqrt(time_dim)
              for c in blk_dims]
    blk_bs = [0.1 * jax.random.normal(next(keys), (c,), jnp.float32) for c in blk_dims]

    # One-time packing (parameter-init time, NOT in the per-step forward path).
    packed = pack_unet_time_params(w1, b1, w2, b2, wy, by, blk_ws, blk_bs)

    t_out, blk_out = unet_time_conditioning(time, y, packed)
    t_out, blk_out = jax.block_until_ready((t_out, blk_out))

    t_ref, blk_refs = _reference(time, y, w1, b1, w2, b2, wy, by, blk_ws, blk_bs)

    meta = packed["meta"]
    assert t_out.shape == (batch, time_dim) and t_out.dtype == jnp.float32
    assert blk_out.shape == (batch, meta["sum_c_pad"]) and blk_out.dtype == jnp.float32
    assert bool(jnp.all(jnp.isfinite(t_out))) and bool(jnp.all(jnp.isfinite(blk_out)))

    ref_scale = max(float(jnp.max(jnp.abs(t_ref))), 1.0)
    errs = [float(jnp.max(jnp.abs(t_out - t_ref)))]
    for off, c, br in zip(meta["blk_offsets"], meta["blk_dims"], blk_refs):
        ref_scale = max(ref_scale, float(jnp.max(jnp.abs(br))))
        errs.append(float(jnp.max(jnp.abs(blk_out[:, off:off + c] - br))))
    max_err = max(errs)
    # Weights are stored bf16 in the packed slabs (documented quantization); activations f32.
    assert max_err <= 1e-2 * ref_scale, f"max_err={max_err}, ref_scale={ref_scale}"

    print("KERNEL_OK")
</pallas_src>

<mosaic_0001>
module attributes {stable_mosaic.version = 11 : i64} {
  func.func @_time_cond_kernel(%arg0: memref<8x1xf32, #tpu.memory_space<vmem>>, %arg1: memref<8x9xf32, #tpu.memory_space<vmem>>, %arg2: memref<192x128xbf16, #tpu.memory_space<vmem>>, %arg3: memref<128x512xbf16, #tpu.memory_space<vmem>>, %arg4: memref<1x512xf32, #tpu.memory_space<vmem>>, %arg5: memref<8x128xf32, #tpu.memory_space<vmem>>, %arg6: memref<8x512xf32, #tpu.memory_space<vmem>>) attributes {dimension_semantics = [], scalar_prefetch = 0 : i64, scratch_operands = 0 : i64, tpu.core_type = #tpu.core_type<tc>} {
    %0 = tpu.iota {dimensions = array<i32: 1>} : vector<1x32xi32>
    %c16_i32 = arith.constant 16 : i32
    %1 = vector.broadcast %c16_i32 : i32 to vector<1x32xi32>
    %2 = arith.cmpi slt, %0, %1 : vector<1x32xi32>
    %c16_i32_0 = arith.constant 16 : i32
    %3 = vector.broadcast %c16_i32_0 : i32 to vector<1x32xi32>
    %4 = arith.subi %0, %3 : vector<1x32xi32>
    %5 = arith.select %2, %0, %4 : vector<1x32xi1>, vector<1x32xi32>
    %6 = arith.sitofp %5 : vector<1x32xi32> to vector<1x32xf32>
    %cst = arith.constant -0.614022672 : f32
    %7 = vector.broadcast %cst : f32 to vector<1x32xf32>
    %8 = arith.mulf %6, %7 : vector<1x32xf32>
    %9 = math.exp %8 : vector<1x32xf32>
    %c0 = arith.constant 0 : index
    %c0_1 = arith.constant 0 : index
    %10 = vector.load %arg0[%c0, %c0_1] : memref<8x1xf32, #tpu.memory_space<vmem>>, vector<8x1xf32>
    %11 = vector.broadcast %10 : vector<8x1xf32> to vector<8x32xf32>
    %12 = vector.broadcast %9 : vector<1x32xf32> to vector<8x32xf32>
    %13 = arith.mulf %11, %12 : vector<8x32xf32>
    %c16_i32_2 = arith.constant 16 : i32
    %14 = vector.broadcast %c16_i32_2 : i32 to vector<1x32xi32>
    %15 = arith.cmpi slt, %0, %14 : vector<1x32xi32>
    %16 = math.sin %13 : vector<8x32xf32>
    %17 = math.cos %13 : vector<8x32xf32>
    %18 = vector.shape_cast %15 : vector<1x32xi1> to vector<1x32xi1>
    %19 = vector.broadcast %18 : vector<1x32xi1> to vector<8x32xi1>
    %20 = arith.select %19, %16, %17 : vector<8x32xi1>, vector<8x32xf32>
    %c0_3 = arith.constant 0 : index
    %c0_4 = arith.constant 0 : index
    %21 = vector.load %arg2[%c0_3, %c0_4] : memref<192x128xbf16, #tpu.memory_space<vmem>>, vector<32x128xbf16>
    %22 = arith.extf %21 : vector<32x128xbf16> to vector<32x128xf32>
    %c32 = arith.constant 32 : index
    %c0_5 = arith.constant 0 : index
    %23 = vector.load %arg2[%c32, %c0_5] : memref<192x128xbf16, #tpu.memory_space<vmem>>, vector<16x128xbf16>
    %24 = arith.extf %23 : vector<16x128xbf16> to vector<16x128xf32>
    %c48 = arith.constant 48 : index
    %c0_6 = arith.constant 0 : index
    %25 = vector.load %arg2[%c48, %c0_6] : memref<192x128xbf16, #tpu.memory_space<vmem>>, vector<128x128xbf16>
    %26 = arith.extf %25 : vector<128x128xbf16> to vector<128x128xf32>
    %c176 = arith.constant 176 : index
    %c0_7 = arith.constant 0 : index
    %27 = vector.load %arg2[%c176, %c0_7] : memref<192x128xbf16, #tpu.memory_space<vmem>>, vector<16x128xbf16>
    %28 = arith.extf %27 : vector<16x128xbf16> to vector<16x128xf32>
    %29 = vector.extract_strided_slice %28 {offsets = [0, 0], sizes = [1, 128], strides = [1, 1]} : vector<16x128xf32> to vector<1x128xf32>
    %30 = vector.extract_strided_slice %28 {offsets = [1, 0], sizes = [1, 128], strides = [1, 1]} : vector<16x128xf32> to vector<1x128xf32>
    %cst_8 = arith.constant dense<0.000000e+00> : vector<8x128xf32>
    %31 = tpu.matmul %20, %22, %cst_8 {dimension_numbers = #tpu.dot_dimension_numbers<[1], [0], [0], [1], [0, 0, 1, 1], [], []>, precision = #tpu.contract_precision<fp32>} : vector<8x32xf32>, vector<32x128xf32>, vector<8x128xf32> -> vector<8x128xf32>
    %32 = vector.broadcast %29 : vector<1x128xf32> to vector<8x128xf32>
    %33 = arith.addf %31, %32 : vector<8x128xf32>
    %cst_9 = arith.constant 0.000000e+00 : f32
    %34 = vector.broadcast %cst_9 : f32 to vector<8x128xf32>
    %35 = arith.subf %34, %33 : vector<8x128xf32>
    %36 = math.exp %35 : vector<8x128xf32>
    %cst_10 = arith.constant 1.000000e+00 : f32
    %37 = vector.broadcast %cst_10 : f32 to vector<8x128xf32>
    %38 = arith.addf %37, %36 : vector<8x128xf32>
    %cst_11 = arith.constant 1.000000e+00 : f32
    %39 = vector.broadcast %cst_11 : f32 to vector<8x128xf32>
    %40 = arith.divf %39, %38 : vector<8x128xf32>
    %41 = arith.mulf %33, %40 : vector<8x128xf32>
    %cst_12 = arith.constant dense<0.000000e+00> : vector<8x128xf32>
    %42 = tpu.matmul %41, %26, %cst_12 {dimension_numbers = #tpu.dot_dimension_numbers<[1], [0], [0], [1], [0, 0, 1, 1], [], []>, precision = #tpu.contract_precision<fp32>} : vector<8x128xf32>, vector<128x128xf32>, vector<8x128xf32> -> vector<8x128xf32>
    %43 = vector.broadcast %30 : vector<1x128xf32> to vector<8x128xf32>
    %44 = arith.addf %42, %43 : vector<8x128xf32>
    %c0_13 = arith.constant 0 : index
    %c0_14 = arith.constant 0 : index
    %45 = vector.load %arg1[%c0_13, %c0_14] : memref<8x9xf32, #tpu.memory_space<vmem>>, vector<8x9xf32>
    %46 = vector.extract_strided_slice %45 {offsets = [0, 0], sizes = [8, 1], strides = [1, 1]} : vector<8x9xf32> to vector<8x1xf32>
    %47 = vector.extract_strided_slice %24 {offsets = [0, 0], sizes = [1, 128], strides = [1, 1]} : vector<16x128xf32> to vector<1x128xf32>
    %48 = vector.broadcast %46 : vector<8x1xf32> to vector<8x128xf32>
    %49 = vector.broadcast %47 : vector<1x128xf32> to vector<8x128xf32>
    %50 = arith.mulf %48, %49 : vector<8x128xf32>
    %51 = arith.addf %44, %50 : vector<8x128xf32>
    %52 = vector.extract_strided_slice %45 {offsets = [0, 1], sizes = [8, 1], strides = [1, 1]} : vector<8x9xf32> to vector<8x1xf32>
    %53 = vector.extract_strided_slice %24 {offsets = [1, 0], sizes = [1, 128], strides = [1, 1]} : vector<16x128xf32> to vector<1x128xf32>
    %54 = vector.broadcast %52 : vector<8x1xf32> to vector<8x128xf32>
    %55 = vector.broadcast %53 : vector<1x128xf32> to vector<8x128xf32>
    %56 = arith.mulf %54, %55 : vector<8x128xf32>
    %57 = arith.addf %51, %56 : vector<8x128xf32>
    %58 = vector.extract_strided_slice %45 {offsets = [0, 2], sizes = [8, 1], strides = [1, 1]} : vector<8x9xf32> to vector<8x1xf32>
    %59 = vector.extract_strided_slice %24 {offsets = [2, 0], sizes = [1, 128], strides = [1, 1]} : vector<16x128xf32> to vector<1x128xf32>
    %60 = vector.broadcast %58 : vector<8x1xf32> to vector<8x128xf32>
    %61 = vector.broadcast %59 : vector<1x128xf32> to vector<8x128xf32>
    %62 = arith.mulf %60, %61 : vector<8x128xf32>
    %63 = arith.addf %57, %62 : vector<8x128xf32>
    %64 = vector.extract_strided_slice %45 {offsets = [0, 3], sizes = [8, 1], strides = [1, 1]} : vector<8x9xf32> to vector<8x1xf32>
    %65 = vector.extract_strided_slice %24 {offsets = [3, 0], sizes = [1, 128], strides = [1, 1]} : vector<16x128xf32> to vector<1x128xf32>
    %66 = vector.broadcast %64 : vector<8x1xf32> to vector<8x128xf32>
    %67 = vector.broadcast %65 : vector<1x128xf32> to vector<8x128xf32>
    %68 = arith.mulf %66, %67 : vector<8x128xf32>
    %69 = arith.addf %63, %68 : vector<8x128xf32>
    %70 = vector.extract_strided_slice %45 {offsets = [0, 4], sizes = [8, 1], strides = [1, 1]} : vector<8x9xf32> to vector<8x1xf32>
    %71 = vector.extract_strided_slice %24 {offsets = [4, 0], sizes = [1, 128], strides = [1, 1]} : vector<16x128xf32> to vector<1x128xf32>
    %72 = vector.broadcast %70 : vector<8x1xf32> to vector<8x128xf32>
    %73 = vector.broadcast %71 : vector<1x128xf32> to vector<8x128xf32>
    %74 = arith.mulf %72, %73 : vector<8x128xf32>
    %75 = arith.addf %69, %74 : vector<8x128xf32>
    %76 = vector.extract_strided_slice %45 {offsets = [0, 5], sizes = [8, 1], strides = [1, 1]} : vector<8x9xf32> to vector<8x1xf32>
    %77 = vector.extract_strided_slice %24 {offsets = [5, 0], sizes = [1, 128], strides = [1, 1]} : vector<16x128xf32> to vector<1x128xf32>
    %78 = vector.broadcast %76 : vector<8x1xf32> to vector<8x128xf32>
    %79 = vector.broadcast %77 : vector<1x128xf32> to vector<8x128xf32>
    %80 = arith.mulf %78, %79 : vector<8x128xf32>
    %81 = arith.addf %75, %80 : vector<8x128xf32>
    %82 = vector.extract_strided_slice %45 {offsets = [0, 6], sizes = [8, 1], strides = [1, 1]} : vector<8x9xf32> to vector<8x1xf32>
    %83 = vector.extract_strided_slice %24 {offsets = [6, 0], sizes = [1, 128], strides = [1, 1]} : vector<16x128xf32> to vector<1x128xf32>
    %84 = vector.broadcast %82 : vector<8x1xf32> to vector<8x128xf32>
    %85 = vector.broadcast %83 : vector<1x128xf32> to vector<8x128xf32>
    %86 = arith.mulf %84, %85 : vector<8x128xf32>
    %87 = arith.addf %81, %86 : vector<8x128xf32>
    %88 = vector.extract_strided_slice %45 {offsets = [0, 7], sizes = [8, 1], strides = [1, 1]} : vector<8x9xf32> to vector<8x1xf32>
    %89 = vector.extract_strided_slice %24 {offsets = [7, 0], sizes = [1, 128], strides = [1, 1]} : vector<16x128xf32> to vector<1x128xf32>
    %90 = vector.broadcast %88 : vector<8x1xf32> to vector<8x128xf32>
    %91 = vector.broadcast %89 : vector<1x128xf32> to vector<8x128xf32>
    %92 = arith.mulf %90, %91 : vector<8x128xf32>
    %93 = arith.addf %87, %92 : vector<8x128xf32>
    %94 = vector.extract_strided_slice %45 {offsets = [0, 8], sizes = [8, 1], strides = [1, 1]} : vector<8x9xf32> to vector<8x1xf32>
    %95 = vector.extract_strided_slice %24 {offsets = [8, 0], sizes = [1, 128], strides = [1, 1]} : vector<16x128xf32> to vector<1x128xf32>
    %96 = vector.broadcast %94 : vector<8x1xf32> to vector<8x128xf32>
    %97 = vector.broadcast %95 : vector<1x128xf32> to vector<8x128xf32>
    %98 = arith.mulf %96, %97 : vector<8x128xf32>
    %99 = arith.addf %93, %98 : vector<8x128xf32>
    %c0_15 = arith.constant 0 : index
    %c0_16 = arith.constant 0 : index
    %100 = vector.load %arg5[%c0_15, %c0_16] : memref<8x128xf32, #tpu.memory_space<vmem>>, vector<8x128xf32>
    tpu.vector_store %arg5[%c0_15, %c0_16], %99 {strides = array<i32>} : memref<8x128xf32, #tpu.memory_space<vmem>>, vector<8x128xf32>,
    %cst_17 = arith.constant 0.707106769 : f32
    %101 = vector.broadcast %cst_17 : f32 to vector<8x128xf32>
    %102 = arith.mulf %99, %101 : vector<8x128xf32>
    %103 = math.absf %102 : vector<8x128xf32>
    %cst_18 = arith.constant 0.327591091 : f32
    %104 = vector.broadcast %cst_18 : f32 to vector<8x128xf32>
    %105 = arith.mulf %104, %103 : vector<8x128xf32>
    %cst_19 = arith.constant 1.000000e+00 : f32
    %106 = vector.broadcast %cst_19 : f32 to vector<8x128xf32>
    %107 = arith.addf %106, %105 : vector<8x128xf32>
    %cst_20 = arith.constant 1.000000e+00 : f32
    %108 = vector.broadcast %cst_20 : f32 to vector<8x128xf32>
    %109 = arith.divf %108, %107 : vector<8x128xf32>
    %cst_21 = arith.constant 1.06140542 : f32
    %110 = vector.broadcast %cst_21 : f32 to vector<8x128xf32>
    %111 = arith.mulf %109, %110 : vector<8x128xf32>
    %cst_22 = arith.constant -1.45315206 : f32
    %112 = vector.broadcast %cst_22 : f32 to vector<8x128xf32>
    %113 = arith.addf %112, %111 : vector<8x128xf32>
    %114 = arith.mulf %109, %113 : vector<8x128xf32>
    %cst_23 = arith.constant 1.42141378 : f32
    %115 = vector.broadcast %cst_23 : f32 to vector<8x128xf32>
    %116 = arith.addf %115, %114 : vector<8x128xf32>
    %117 = arith.mulf %109, %116 : vector<8x128xf32>
    %cst_24 = arith.constant -0.284496725 : f32
    %118 = vector.broadcast %cst_24 : f32 to vector<8x128xf32>
    %119 = arith.addf %118, %117 : vector<8x128xf32>
    %120 = arith.mulf %109, %119 : vector<8x128xf32>
    %cst_25 = arith.constant 0.254829586 : f32
    %121 = vector.broadcast %cst_25 : f32 to vector<8x128xf32>
    %122 = arith.addf %121, %120 : vector<8x128xf32>
    %123 = arith.mulf %109, %122 : vector<8x128xf32>
    %cst_26 = arith.constant 0.000000e+00 : f32
    %124 = vector.broadcast %cst_26 : f32 to vector<8x128xf32>
    %125 = arith.subf %124, %103 : vector<8x128xf32>
    %126 = arith.mulf %125, %103 : vector<8x128xf32>
    %127 = math.exp %126 : vector<8x128xf32>
    %128 = arith.mulf %123, %127 : vector<8x128xf32>
    %cst_27 = arith.constant 1.000000e+00 : f32
    %129 = vector.broadcast %cst_27 : f32 to vector<8x128xf32>
    %130 = arith.subf %129, %128 : vector<8x128xf32>
    %cst_28 = arith.constant 0.000000e+00 : f32
    %131 = vector.broadcast %cst_28 : f32 to vector<8x128xf32>
    %132 = arith.cmpf oge, %102, %131 : vector<8x128xf32>
    %cst_29 = arith.constant 0.000000e+00 : f32
    %133 = vector.broadcast %cst_29 : f32 to vector<8x128xf32>
    %134 = arith.subf %133, %130 : vector<8x128xf32>
    %135 = arith.select %132, %130, %134 : vector<8x128xi1>, vector<8x128xf32>
    %cst_30 = arith.constant 5.000000e-01 : f32
    %136 = vector.broadcast %cst_30 : f32 to vector<8x128xf32>
    %137 = arith.mulf %136, %99 : vector<8x128xf32>
    %cst_31 = arith.constant 1.000000e+00 : f32
    %138 = vector.broadcast %cst_31 : f32 to vector<8x128xf32>
    %139 = arith.addf %138, %135 : vector<8x128xf32>
    %140 = arith.mulf %137, %139 : vector<8x128xf32>
    %141 = arith.truncf %140 : vector<8x128xf32> to vector<8x128xbf16>
    %c0_32 = arith.constant 0 : index
    %c0_33 = arith.constant 0 : index
    %142 = vector.load %arg3[%c0_32, %c0_33] : memref<128x512xbf16, #tpu.memory_space<vmem>>, vector<128x512xbf16>
    %cst_34 = arith.constant dense<0.000000e+00> : vector<8x512xf32>
    %143 = tpu.matmul %141, %142, %cst_34 {dimension_numbers = #tpu.dot_dimension_numbers<[1], [0], [0], [1], [0, 0, 1, 1], [], []>} : vector<8x128xbf16>, vector<128x512xbf16>, vector<8x512xf32> -> vector<8x512xf32>
    %c0_35 = arith.constant 0 : index
    %c0_36 = arith.constant 0 : index
    %144 = vector.load %arg4[%c0_35, %c0_36] : memref<1x512xf32, #tpu.memory_space<vmem>>, vector<1x512xf32>
    %145 = vector.broadcast %144 : vector<1x512xf32> to vector<8x512xf32>
    %146 = arith.addf %143, %145 : vector<8x512xf32>
    %c0_37 = arith.constant 0 : index
    %c0_38 = arith.constant 0 : index
    %147 = vector.load %arg6[%c0_37, %c0_38] : memref<8x512xf32, #tpu.memory_space<vmem>>, vector<8x512xf32>
    tpu.vector_store %arg6[%c0_37, %c0_38], %146 {strides = array<i32>} : memref<8x512xf32, #tpu.memory_space<vmem>>, vector<8x512xf32>,
    return
  }
}

</mosaic_0001>

<bundles_post_ra>
// kernel: tpu_custom_call.1
= control target key start
LH: loop header
LB: loop body
LE: loop exit
PB: predicated region body
PF: predicated region fallthrough
CT: control target
= control target key end

     0   :  { %12 = vsyncpa [#allocation3], 0  ;;  %s2137_s0 = inlined_call_operand.vmem [shape: f32[8,1], index: 0, kind: input, shape index: {}]   ;;  %s2138_s1 = inlined_call_operand.vmem [shape: f32[8,9], index: 1, kind: input, shape index: {}]   ;;  %s2139_s2 = inlined_call_operand.hbm [shape: bf16[192,128], index: 2, kind: input, shape index: {}]   ;;  %s2140_s3 = inlined_call_operand.hbm [shape: bf16[128,512], index: 3, kind: input, shape index: {}]   ;;  %s2141_s4 = inlined_call_operand.vmem [shape: f32[1,512], index: 4, kind: input, shape index: {}]   ;;  %s2142_s5 = inlined_call_operand.hbm [shape: f32[8,128], index: 5, kind: output, shape index: {0}]   ;;  %s2143_s6 = inlined_call_operand.hbm [shape: f32[8,512], index: 6, kind: output, shape index: {1}]  }
   0x1   :  { %13 = vsyncpa [#allocation6], 0 }
   0x2   :  { %14 = vsyncpa [#allocation4], 0 }
   0x3   :  { %15 = vsyncpa [#allocation9], 0  ;;  %s24_s23 = sshll.u32 %s2139_s2, 4  ;;  %s1629_s24 = smov [#allocation2]   ;;  %s25_s23 = int_to_ptr.hbm [resolvable:$true] %s24_s23 }
   0x4   :  { %s26_s25 = sshll.u32 %s1629_s24, 4  ;;  %s37_s28 = sshll.u32 %s2140_s3, 4  ;;  %s27_s25 = int_to_ptr.vmem [resolvable:$true] %s26_s25  ;;  %s38_s28 = int_to_ptr.hbm [resolvable:$true] %s37_s28 }
   0x5   :  { %s1630_s29 = smov 64   ;;  %s1631_s30 = smov 4  }
   0x6   :  { %32 = dma.hbm_to_vmem [thread:$0]  %s25_s23, 1536, %s27_s25, [#allocation3], %s1630_s29, %s1630_s29, %s1631_s30  }
   0x7   :  { %s1632_s7 = smov [#allocation5]   ;;  %s1633_s9 = smov 256  }
   0x8   :  { %s39_s8 = sshll.u32 %s1632_s7, 4  ;;  %s1634_s10 = smov 16   ;;  %s40_s8 = int_to_ptr.vmem [resolvable:$true] %s39_s8 }
   0x9   :  { %45 = dma.hbm_to_vmem [thread:$0]  %s38_s28, 4096, %s40_s8, [#allocation6], %s1633_s9, %s1633_s9, %s1634_s10  }
   0xa   :  { %1621 = dma.done.wait [#allocation3], 1536  }
   0xb   :  { %1622 = vsyncadd [#allocation3], 4294965760 }
   0xc   :  { %1623 = dma.done.wait [#allocation6], 4096  }
   0xd   :  { %1624 = vsyncadd [#allocation6], 4294963200  ;;  %v1635_v0 = vmov 0   ;;  %v65_v1 = vld [vmem:[%s2137_s0] sm:$0xff]  ;;  %v56_v3 = vlaneseq  ;;  %v1636_v24 = vmov 683565275  }
   0xe   :  { %1505 = vset.pattern.permute.xlu0 %v1635_v0  ;;  %v1700_v2 = vld [vmem:[%s2138_s1] sm:$0xff]  ;;  %v1637_v26 = vmov 2475754826   ;;  %v1638_v29 = vmov 2131351028   ;;  %s1650_s0 = smov [#allocation7]  }
   0xf   :  { %68 = vperm.xlu0 %1505, %v65_v1   ;;  %v1703_v4 = vand.u32 127, %v56_v3  ;;  %v1639_v32 = vmov 2102212464   ;;  %v1640_v35 = vmov 920167782   ;;  %s1232_s1 = sshll.u32 %s1650_s0, 4  ;;  %s1233_s1 = int_to_ptr.vmem [resolvable:$true] %s1232_s1 }
  0x10   :  { %v1641_v38 = vmov 1326507024   ;;  %s1234_s15 = sshll.u32 %s2142_s5, 4  ;;  %s1651_s18 = smov [#allocation8]   ;;  %s1235_s15 = int_to_ptr.hbm [resolvable:$true] %s1234_s15 }
  0x11   :  { %v1261_v5 = vadd.s32 4294967280, %v1703_v4  ;;  %vm58_vm0 = vcmp.lt.s32.totalorder %v1703_v4, 16  ;;  %s1243_s19 = sshll.u32 %s1651_s18, 4  ;;  %s1245_s21 = sshll.u32 %s2143_s6, 4  ;;  %s1244_s19 = int_to_ptr.vmem [resolvable:$true] %s1243_s19  ;;  %s1246_s21 = int_to_ptr.hbm [resolvable:$true] %s1245_s21 }
  0x13   :  { %v60_v6 = vsel %vm58_vm0, %v1703_v4, %v1261_v5  ;;  %v1481_v4 = vld [vmem:[#allocation2 + $0x50] sm:$0xff]  }
  0x14   :  { %v61_v7 = vcvt.s32.f32 %v60_v6 }
  0x16   :  { %v62_v8 = vmul.f32 -0.6140227, %v61_v7 }
  0x17   :  { %865 = vperm.xlu0 %1505, %v1700_v2  }
  0x18   :  { %v63_v9 = vmul.f32 1.442695, %v62_v8 }
  0x1a   :  { %1515 = vpow2.f32 %v63_v9 }
  0x20   :  { %v1516_v10 = vpop.eup %1515 }
  0x81   :  { %v69_v11 = vpop.permute.xlu0 %68 }
  0x82   :  { %v1710_v12 = vmul.f32 %v1516_v10, %v69_v11 }
  0x84   :  { %v75_v13 = vand.u32 2139095040, %v1710_v12  ;;  %v72_v16 = vand.u32 2147483647, %v1710_v12  ;;  %vm74_vm13 = vcmp.lt.s32.totalorder %v1710_v12, 0 }
  0x86   :  { %v76_v14 = vshrl.u32 %v75_v13, 23  ;;  %v79_v18 = vand.u32 8388607, %v72_v16  ;;  %vm73_vm14 = vcmp.le.f32.partialorder %v72_v16, 0.7853982 }
  0x88   :  { %v1262_v15 = vadd.s32 4294967169, %v76_v14  ;;  %v80_v22 = vor.u32 8388608, %v79_v18 }
  0x8a   :  { %v82_v17 = vadd.s32 1, %v1262_v15  ;;  %v1727_v45 = vshll.u32 %v80_v22, 8 }
  0x8c   :  { %vm83_vm1 = vcmp.gt.s32.totalorder %v82_v17, 0  ;;  %v121_v54 = vand.u32 65535, %v1727_v45  ;;  %v122_v55 = vshrl.u32 %v1727_v45, 16 }
  0x8d   :  { %v84_v19 = vsel %vm83_vm1, %v82_v17, 0 }
  0x8e   :  { %v86_v20 = vand.u32 31, %v84_v19  ;;  %v1718_v23 = vshrl.u32 %v84_v19, 5 }
  0x90   :  { %v1716_v21 = vsub.s32 32, %v86_v20  ;;  %v89_v25 = vshll.u32 %v1636_v24, %v86_v20  ;;  %v92_v27 = vshll.u32 %v1637_v26, %v86_v20  ;;  %v95_v31 = vshll.u32 %v1638_v29, %v86_v20 }
  0x91   :  { %v98_v34 = vshll.u32 %v1639_v32, %v86_v20  ;;  %v101_v37 = vshll.u32 %v1640_v35, %v86_v20  ;;  %vm104_vm2 = vcmp.lt.s32.totalorder %v1718_v23, 1  ;;  %vm107_vm3 = vcmp.lt.s32.totalorder %v1718_v23, 4 }
  0x92   :  { %v90_v28 = vshrl.u32 %v1637_v26, %v1716_v21  ;;  %v93_v30 = vshrl.u32 %v1638_v29, %v1716_v21  ;;  %v96_v33 = vshrl.u32 %v1639_v32, %v1716_v21  ;;  %v99_v36 = vshrl.u32 %v1640_v35, %v1716_v21 }
  0x93   :  { %v102_v39 = vshrl.u32 %v1641_v38, %v1716_v21  ;;  %vm106_vm4 = vcmp.lt.s32.totalorder %v1718_v23, 3  ;;  %vm105_vm5 = vcmp.lt.s32.totalorder %v1718_v23, 2  ;;  %v88_v22 = vshrl.u32 %v1636_v24, %v1716_v21 }
  0x94   :  { %v91_v40 = vor.u32 %v90_v28, %v89_v25  ;;  %v94_v41 = vor.u32 %v93_v30, %v92_v27  ;;  %v97_v42 = vor.u32 %v96_v33, %v95_v31  ;;  %v100_v43 = vor.u32 %v99_v36, %v98_v34 }
  0x95   :  { %v103_v44 = vor.u32 %v102_v39, %v101_v37 }
  0x96   :  { %v112_v46 = vsel %vm104_vm2, %v91_v40, %v94_v41  ;;  %v116_v47 = vsel %vm104_vm2, %v94_v41, %v97_v42  ;;  %v113_v48 = vsel %vm107_vm3, %v100_v43, 920167782  ;;  %v109_v18 = vsel %vm107_vm3, %v97_v42, 2102212464 }
  0x97   :  { %v117_v49 = vsel %vm107_vm3, %v103_v44, 1326507024  ;;  %v114_v50 = vsel %vm106_vm4, %v97_v42, %v113_v48  ;;  %v108_v30 = vsel %vm104_vm2, %v88_v22, %v91_v40  ;;  %v110_v31 = vsel %vm106_vm4, %v94_v41, %v109_v18 }
  0x98   :  { %v118_v51 = vsel %vm106_vm4, %v100_v43, %v117_v49  ;;  %v115_v52 = vsel %vm105_vm5, %v112_v46, %v114_v50  ;;  %v111_v21 = vsel %vm105_vm5, %v108_v30, %v110_v31 }
  0x99   :  { %v119_v53 = vsel %vm105_vm5, %v116_v47, %v118_v51  ;;  %v145_v58 = vand.u32 65535, %v115_v52  ;;  %v146_v59 = vshrl.u32 %v115_v52, 16  ;;  %v165_v38 = vmul.u32 %v1727_v45, %v111_v21  ;;  %v1472_v47 = vld [vmem:[#allocation2 + $0x8] sm:$0xff]   ;;  %v1429_v52 = vld [vmem:[#allocation2] sm:$0xff]  }
  0x9a   :  { %v123_v56 = vand.u32 65535, %v119_v53  ;;  %v124_v57 = vshrl.u32 %v119_v53, 16  ;;  %v1768_v49 = vunpack.c.h.bf16 %v1472_v47  ;;  %v1774_v45 = vunpack.c.l.bf16 %v1472_v47 }
  0x9b   :  { %v148_v62 = vmul.u32 %v146_v59, %v121_v54  ;;  %v149_v63 = vmul.u32 %v145_v58, %v122_v55  ;;  %v147_v6 = vmul.u32 %v145_v58, %v121_v54  ;;  %v150_v10 = vmul.u32 %v146_v59, %v122_v55 }
  0x9c   :  { %v126_v60 = vmul.u32 %v124_v57, %v121_v54  ;;  %v127_v61 = vmul.u32 %v123_v56, %v122_v55  ;;  %v125_v1 = vmul.u32 %v123_v56, %v121_v54  ;;  %v128_v5 = vmul.u32 %v124_v57, %v122_v55  ;;  %447 = vmatpush.msra.mxu0 %v1768_v49 }
  0x9d   :  { %v151_v7 = vshll.u32 %v148_v62, 16  ;;  %v153_v13 = vshll.u32 %v149_v63, 16  ;;  %v152_v28 = vshrl.u32 %v148_v62, 16  ;;  %v154_v34 = vshrl.u32 %v149_v63, 16 }
  0x9e   :  { %v129_v3 = vshll.u32 %v126_v60, 16  ;;  %v131_v8 = vshll.u32 %v127_v61, 16  ;;  %v130_v25 = vshrl.u32 %v126_v60, 16  ;;  %v132_v32 = vshrl.u32 %v127_v61, 16  ;;  %448 = vmatpush.msra.mxu0 %v1774_v45 }
  0x9f   :  { %vm155_vm7 = vc.u32 %v147_v6, %v151_v7  ;;  %v157_v14 = vadd.s32 %v151_v7, %v147_v6  ;;  %v1772_v50 = vsub.f32 %v1768_v49, %v1768_v49  ;;  %v1780_v54 = vsub.f32 %v1774_v45, %v1774_v45 }
  0xa0   :  { %vm133_vm6 = vc.u32 %v125_v1, %v129_v3  ;;  %v135_v9 = vadd.s32 %v129_v3, %v125_v1  ;;  %v156_v17 = vsel %vm155_vm7, 1, %v1635_v0  ;;  %v1782_v55 = vunpack.c.h.bf16 %v1429_v52 }
  0xa1   :  { %v134_v11 = vsel %vm133_vm6, 1, %v1635_v0  ;;  %v158_v20 = vadd.s32 %v156_v17, %v150_v10  ;;  %vm159_vm9 = vc.u32 %v157_v14, %v153_v13  ;;  %v161_v37 = vadd.s32 %v157_v14, %v153_v13 }
  0xa2   :  { %v136_v15 = vadd.s32 %v134_v11, %v128_v5  ;;  %vm137_vm8 = vc.u32 %v135_v9, %v131_v8  ;;  %v160_v27 = vsel %vm159_vm9, 1, %v1635_v0  ;;  %v473_v53 = vand.u32 4294901760, %v1772_v50  ;;  %449 = vmatpush.msra.mxu0 %v1782_v55 }
  0xa3   :  { %v138_v19 = vsel %vm137_vm8, 1, %v1635_v0  ;;  %v162_v29 = vadd.s32 %v160_v27, %v158_v20  ;;  %v478_v58 = vand.u32 4294901760, %v1780_v54  ;;  %v1791_v59 = vsub.f32 %v1782_v55, %v1782_v55 }
  0xa4   :  { %v140_v26 = vadd.s32 %v138_v19, %v136_v15  ;;  %v474_v57 = vsub.f32 %v1772_v50, %v473_v53  ;;  %v1794_v63 = vunpack.c.l.bf16 %v1429_v52  ;;  %vm215_vm6 = vweird.f32 %v1710_v12 }
  0xa5   :  { %v163_v35 = vadd.s32 %v162_v29, %v152_v28  ;;  %v479_v3 = vsub.f32 %v1780_v54, %v478_v58  ;;  %v483_v5 = vand.u32 4294901760, %v1791_v59  ;;  %vm431_vm7 = vcmask 261120  }
  0xa6   :  { %v141_v33 = vadd.s32 %v140_v26, %v130_v25  ;;  %v475_v1 = vand.u32 4294901760, %v474_v57  ;;  %v1802_v9 = vsub.f32 %v1794_v63, %v1794_v63  ;;  %450 = vmatpush.msra.mxu0 %v1794_v63 }
  0xa7   :  { %v164_v24 = vadd.s32 %v163_v35, %v154_v34  ;;  %v480_v10 = vand.u32 4294901760, %v479_v3  ;;  %v484_v11 = vsub.f32 %v1791_v59, %v483_v5 }
  0xa8   :  { %v142_v36 = vadd.s32 %v141_v33, %v132_v32  ;;  %476 = vmatpush.msra.mxu1 %v475_v1  ;;  %510 = vmatpush.msrb.mxu0 %v1772_v50  ;;  %v488_v15 = vand.u32 4294901760, %v1802_v9  ;;  %v1847_v50 = vunpack.c.l.bf16 %v1481_v4 }
  0xa9   :  { %v168_v0 = vadd.s32 1, %v164_v24  ;;  %v485_v17 = vand.u32 4294901760, %v484_v11  ;;  %v1479_v11 = vld [vmem:[#allocation2 + $0x40] sm:$0xff]  }
  0xaa   :  { %vm167_vm10 = vc.u32 %v142_v36, %v161_v37  ;;  %v166_v60 = vadd.s32 %v161_v37, %v142_v36  ;;  %481 = vmatpush.msra.mxu1 %v480_v10  ;;  %512 = vmatpush.msrb.mxu0 %v1780_v54  ;;  %v489_v19 = vsub.f32 %v1802_v9, %v488_v15 }
  0xab   :  { %v169_v39 = vsel %vm167_vm10, %v168_v0, %v164_v24 }
  0xac   :  { %v170_v42 = vadd.s32 %v169_v39, %v165_v38  ;;  %486 = vmatpush.msra.mxu1 %v485_v17  ;;  %514 = vmatpush.msrb.mxu0 %v1791_v59  ;;  %v490_v25 = vand.u32 4294901760, %v489_v19 }
  0xae   :  { %v171_v40 = vadd.s32 536870912, %v170_v42  ;;  %516 = vmatpush.msrb.mxu0 %v1802_v9  ;;  %491 = vmatpush.msra.mxu1 %v490_v25  ;;  %v1891_v25 = vunpack.c.l.bf16 %v1479_v11 }
  0xb0   :  { %v1765_v43 = vshrl.u32 %v171_v40, 30  ;;  %535 = vmatpush.msrb.mxu1 %v1768_v49 }
  0xb2   :  { %v173_v41 = vshll.u32 %v1765_v43, 30  ;;  %536 = vmatpush.msrb.mxu1 %v1774_v45  ;;  %v196_v29 = vsub.s32 4, %v1765_v43 }
  0xb4   :  { %v174_v44 = vsub.s32 %v170_v42, %v173_v41  ;;  %537 = vmatpush.msrb.mxu1 %v1782_v55  ;;  %v197_v34 = vsel %vm74_vm13, %v196_v29, %v1765_v43 }
  0xb5   :  { %v199_v37 = vsel %vm73_vm14, 0, %v197_v34 }
  0xb6   :  { %vm175_vm11 = vcmp.lt.s32.totalorder %v174_v44, 0  ;;  %v176_v46 = vsub.s32 0, %v174_v44  ;;  %538 = vmatpush.msrb.mxu1 %v1794_v63  ;;  %v216_v38 = vadd.s32 3, %v199_v37  ;;  %v371_v41 = vand.u32 3, %v199_v37 }
  0xb8   :  { %v177_v48 = vsel %vm175_vm11, %v176_v46, %v174_v44  ;;  %v217_v46 = vand.u32 3, %v216_v38  ;;  %vm372_vm15 = vcmp.lt.s32.totalorder %v371_v41, 2  ;;  %vm373_vm1 = vcmp.eq.s32.totalorder %v371_v41, 0 }
  0xb9   :  { %v178_v23 = vclz %v177_v48  ;;  %vm376_vm5 = vcmp.eq.s32.totalorder %v371_v41, 2 }
  0xba   :  { %vm218_vm2 = vcmp.lt.s32.totalorder %v217_v46, 2  ;;  %vm219_vm3 = vcmp.eq.s32.totalorder %v217_v46, 0  ;;  %vm222_vm4 = vcmp.eq.s32.totalorder %v217_v46, 2 }
  0xbb   :  { %v1263_v51 = vadd.s32 4294967294, %v178_v23 }
  0xbd   :  { %vm1264_vm12 = vcmp.lt.s32.totalorder %v1263_v51, 0 }
  0xbe   :  { %v181_v56 = vsel %vm1264_vm12, 0, %v1263_v51 }
  0xbf   :  { %v182_v61 = vsub.s32 32, %v181_v56  ;;  %v186_v62 = vsub.s32 4294967266, %v181_v56  ;;  %v183_v6 = vshll.u32 %v174_v44, %v181_v56 }
  0xc1   :  { %v184_v7 = vshrl.u32 %v166_v60, %v182_v61  ;;  %v187_v8 = vadd.s32 127, %v186_v62 }
  0xc3   :  { %v185_v13 = vor.u32 %v184_v7, %v183_v6  ;;  %v188_v14 = vshll.u32 %v187_v8, 23 }
  0xc5   :  { %v189_v18 = vor.u32 4788187, %v188_v14  ;;  %v192_v22 = vcvt.s32.f32 %v185_v13 }
  0xc7   :  { %v190_v20 = vand.u32 2147483647, %v189_v18  ;;  %v1884_v18 = vunpack.c.h.bf16 %v1479_v11 }
  0xc9   :  { %v193_v26 = vmul.f32 %v192_v22, %v190_v20 }
  0xcb   :  { %v194_v27 = vxor.u32 2147483648, %v193_v26 }
  0xcd   :  { %v195_v28 = vsel %vm74_vm13, %v194_v27, %v193_v26  ;;  %v1896_v26 = vsub.f32 %v1884_v18, %v1884_v18  ;;  %v1478_v27 = vld [vmem:[#allocation2 + $0x38] sm:$0xff]  }
  0xce   :  { %v198_v30 = vsel %vm73_vm14, %v1710_v12, %v195_v28 }
  0xcf   :  { %v200_v31 = vmul.f32 %v198_v30, %v198_v30 }
  0xd1   :  { %v208_v32 = vmul.f32 -0.00019511016, %v200_v31  ;;  %v201_v33 = vmul.f32 -0.001358992, %v200_v31 }
  0xd3   :  { %v209_v35 = vadd.f32 0.008332121, %v208_v32  ;;  %v202_v36 = vadd.f32 0.041655596, %v201_v33  ;;  %v663_v32 = vand.u32 4294901760, %v1896_v26 }
  0xd5   :  { %v210_v21 = vmul.f32 %v209_v35, %v200_v31  ;;  %v203_v24 = vmul.f32 %v202_v36, %v200_v31  ;;  %v1917_v36 = vunpack.c.l.bf16 %v1478_v27  ;;  %v664_v37 = vsub.f32 %v1896_v26, %v663_v32 }
  0xd7   :  { %v211_v16 = vadd.f32 -0.16666654, %v210_v21  ;;  %v204_v0 = vadd.f32 -0.4999988, %v203_v24  ;;  %v1477_v21 = vld [vmem:[#allocation2 + $0x30] sm:$0xff]  }
  0xd8   :  { %v1933_v38 = vunpack.c.h.bf16 %v1477_v21  ;;  %v1947_v46 = vunpack.c.l.bf16 %v1477_v21 }
  0xd9   :  { %v212_v39 = vmul.f32 %v211_v16, %v200_v31  ;;  %v205_v42 = vmul.f32 %v204_v0, %v200_v31  ;;  %v1907_v31 = vunpack.c.h.bf16 %v1478_v27  ;;  %v1931_v0 = vsub.f32 %v1917_v36, %v1917_v36 }
  0xdb   :  { %v213_v40 = vadd.f32 1.0, %v212_v39  ;;  %v206_v44 = vadd.f32 1.0, %v205_v42  ;;  %v1915_v35 = vsub.f32 %v1907_v31, %v1907_v31  ;;  %v665_v39 = vand.u32 4294901760, %v664_v37 }
  0xdc   :  { %v678_v41 = vand.u32 4294901760, %v1931_v0 }
  0xdd   :  { %v214_v47 = vmul.f32 %v213_v40, %v198_v30  ;;  %v223_v48 = vxor.u32 2147483648, %v206_v44  ;;  %v1905_v30 = vsub.f32 %v1891_v25, %v1891_v25  ;;  %v673_v16 = vand.u32 4294901760, %v1915_v35 }
  0xdf   :  { %v220_v23 = vxor.u32 2147483648, %v214_v47  ;;  %v224_v51 = vsel %vm222_vm4, %v223_v48, %v214_v47  ;;  %v378_v56 = vsel %vm376_vm5, %v223_v48, %v214_v47  ;;  %v668_v34 = vand.u32 4294901760, %v1905_v30  ;;  %v1476_v47 = vld [vmem:[#allocation2 + $0x28] sm:$0xff]  }
  0xe0   :  { %v674_v40 = vsub.f32 %v1915_v35, %v673_v16 }
  0xe1   :  { %v221_v43 = vsel %vm219_vm3, %v206_v44, %v220_v23  ;;  %v375_v52 = vsel %vm373_vm1, %v206_v44, %v220_v23  ;;  %v669_v24 = vsub.f32 %v1905_v30, %v668_v34  ;;  %v1944_v44 = vsub.f32 %v1933_v38, %v1933_v38 }
  0xe2   :  { %v225_v57 = vsel %vm218_vm2, %v221_v43, %v224_v51  ;;  %v379_v60 = vsel %vm372_vm15, %v375_v52, %v378_v56  ;;  %v675_v48 = vand.u32 4294901760, %v674_v40  ;;  %v679_v23 = vsub.f32 %v1931_v0, %v678_v41 }
  0xe3   :  { %v226_v61 = vsel %vm215_vm6, nan, %v225_v57  ;;  %v380_v62 = vsel %vm215_vm6, nan, %v379_v60  ;;  %v670_v42 = vand.u32 4294901760, %v669_v24  ;;  %v683_v43 = vand.u32 4294901760, %v1944_v44 }
  0xe4   :  { %v383_v1 = vsel %vm58_vm0, %v226_v61, %v380_v62  ;;  %v1954_v51 = vunpack.c.h.bf16 %v1476_v47  ;;  %v1960_v52 = vsub.f32 %v1947_v46, %v1947_v46  ;;  %v680_v56 = vand.u32 4294901760, %v679_v23 }
  0xe5   :  { %v433_v3 = vsel %vm431_vm7, %v383_v1, 0  ;;  %v684_v57 = vsub.f32 %v1944_v44, %v683_v43  ;;  %v1970_v61 = vunpack.c.l.bf16 %v1476_v47  ;;  %v1475_v1 = vld [vmem:[#allocation2 + $0x20] sm:$0xff]  }
  0xe6   :  { %v451_v6 = vand.u32 4294901760, %v433_v3  ;;  %v1968_v60 = vsub.f32 %v1954_v51, %v1954_v51  ;;  %v688_v62 = vand.u32 4294901760, %v1960_v52 }
  0xe8   :  { %493 = vmatmul.f32.vlgmr.msra.gmra.mxu1 %v451_v6  ;;  %v452_v7 = vsub.f32 %v433_v3, %v451_v6  ;;  %v685_v3 = vand.u32 4294901760, %v684_v57 }
  0xe9   :  { %587 = vmatpush.msra.mxu1 %v1768_v49  ;;  %v1841_v49 = vunpack.c.h.bf16 %v1481_v4 }
  0xea   :  { %v453_v8 = vand.u32 4294901760, %v452_v7 }
  0xeb   :  { %588 = vmatpush.msra.mxu1 %v1774_v45  ;;  %v1845_v45 = vsub.f32 %v1841_v49, %v1841_v49  ;;  %617 = vmatpush.msra.mxu2 %v1841_v49 }
  0xec   :  { %v454_v10 = vsub.f32 %v452_v7, %v453_v8 }
  0xed   :  { %589 = vmatpush.msra.mxu1 %v1782_v55  ;;  %v643_v54 = vand.u32 4294901760, %v1845_v45  ;;  %v1854_v55 = vsub.f32 %v1847_v50, %v1847_v50  ;;  %618 = vmatpush.msra.mxu2 %v1847_v50 }
  0xee   :  { %v455_v12 = vand.u32 4294901760, %v454_v10  ;;  %v689_v10 = vsub.f32 %v1960_v52, %v688_v62 }
  0xef   :  { %590 = vmatpush.msra.mxu1 %v1794_v63  ;;  %v644_v59 = vsub.f32 %v1845_v45, %v643_v54  ;;  %v648_v63 = vand.u32 4294901760, %v1854_v55 }
  0xf0   :  { %456 = vmatmul.f32.vlgmr.msra.gmra.mxu0 %v455_v12  ;;  %542 = vmatmul.f32.vlgmr.msrb.gmra.mxu1 %v453_v8  ;;  %v1981_v8 = vunpack.c.h.bf16 %v1475_v1  ;;  %v690_v11 = vand.u32 4294901760, %v689_v10 }
  0xf1   :  { %560 = vmatpush.msra.mxu0 %v473_v53  ;;  %765 = vmatpush.msrb.mxu1 %v1841_v49  ;;  %v1480_v53 = vld [vmem:[#allocation2 + $0x48] sm:$0xff]   ;;  %v645_v13 = vand.u32 4294901760, %v644_v59  ;;  %v649_v14 = vsub.f32 %v1854_v55, %v648_v63  ;;  %v1997_v59 = vunpack.c.l.bf16 %v1475_v1 }
  0xf2   :  { %v1869_v9 = vunpack.c.l.bf16 %v1480_v53 }
  0xf3   :  { %563 = vmatpush.msra.mxu0 %v478_v58  ;;  %v1856_v58 = vunpack.c.h.bf16 %v1480_v53  ;;  %766 = vmatpush.msrb.mxu1 %v1847_v50  ;;  %v650_v19 = vand.u32 4294901760, %v649_v14  ;;  %v1995_v53 = vsub.f32 %v1981_v8, %v1981_v8  ;;  %v2008_v27 = vsub.f32 %v1997_v59, %v1997_v59 }
  0xf4   :  { %v1880_v17 = vsub.f32 %v1869_v9, %v1869_v9  ;;  %646 = vmatpush.msra.mxu3 %v645_v13  ;;  %v1474_v13 = vld [vmem:[#allocation2 + $0x18] sm:$0xff]  }
  0xf5   :  { %566 = vmatpush.msra.mxu0 %v483_v5  ;;  %v1867_v5 = vsub.f32 %v1856_v58, %v1856_v58  ;;  %619 = vmatpush.msra.mxu2 %v1856_v58  ;;  %v708_v37 = vand.u32 4294901760, %v2008_v27  ;;  %v2019_v21 = vunpack.c.l.bf16 %v1474_v13 }
  0xf6   :  { %767 = vmatpush.msrb.mxu1 %v1856_v58  ;;  %v658_v22 = vand.u32 4294901760, %v1880_v17  ;;  %651 = vmatpush.msra.mxu3 %v650_v19 }
  0xf7   :  { %569 = vmatpush.msra.mxu0 %v488_v15  ;;  %v653_v15 = vand.u32 4294901760, %v1867_v5  ;;  %620 = vmatpush.msra.mxu2 %v1869_v9  ;;  %v2033_v40 = vsub.f32 %v2019_v21, %v2019_v21 }
  0xf8   :  { %519 = vmatmul.f32.vlgmr.msrb.gmra.mxu0 %v452_v7  ;;  %592 = vmatmul.f32.vlgmr.msra.gmra.mxu1 %v451_v6  ;;  %v659_v29 = vsub.f32 %v1880_v17, %v658_v22  ;;  %v1979_v7 = vsub.f32 %v1970_v61, %v1970_v61 }
  0xf9   :  { %728 = vmatpush.msrb.mxu0 %v1845_v45  ;;  %768 = vmatpush.msrb.mxu1 %v1869_v9  ;;  %v654_v20 = vsub.f32 %v1867_v5, %v653_v15 }
  0xfa   :  { %621 = vmatpush.msra.mxu2 %v1884_v18  ;;  %v660_v33 = vand.u32 4294901760, %v659_v29  ;;  %v698_v4 = vand.u32 4294901760, %v1979_v7 }
  0xfb   :  { %730 = vmatpush.msrb.mxu0 %v1854_v55  ;;  %769 = vmatpush.msrb.mxu1 %v1884_v18  ;;  %v655_v28 = vand.u32 4294901760, %v654_v20  ;;  %v703_v20 = vand.u32 4294901760, %v1995_v53 }
  0xfc   :  { %622 = vmatpush.msra.mxu2 %v1891_v25  ;;  %v699_v19 = vsub.f32 %v1979_v7, %v698_v4 }
  0xfd   :  { %732 = vmatpush.msrb.mxu0 %v1867_v5  ;;  %656 = vmatpush.msra.mxu3 %v655_v28  ;;  %v2012_v28 = vunpack.c.h.bf16 %v1474_v13 }
  0xfe   :  { %770 = vmatpush.msrb.mxu1 %v1891_v25  ;;  %623 = vmatpush.msra.mxu2 %v1907_v31  ;;  %v700_v29 = vand.u32 4294901760, %v699_v19 }
  0xff   :  { %734 = vmatpush.msrb.mxu0 %v1880_v17  ;;  %661 = vmatpush.msra.mxu3 %v660_v33  ;;  %v704_v33 = vsub.f32 %v1995_v53, %v703_v20  ;;  %v2025_v24 = vsub.f32 %v2012_v28, %v2012_v28 }
 0x100   :  { %571 = vmatmul.f32.vlgmr.msra.gmra.mxu0 %v451_v6  ;;  %771 = vmatpush.msrb.mxu1 %v1907_v31  ;;  %v693_v6 = vand.u32 4294901760, %v1968_v60 }
 0x101   :  { %736 = vmatpush.msrb.mxu0 %v1896_v26  ;;  %624 = vmatpush.msra.mxu2 %v1917_v36  ;;  %v713_v47 = vand.u32 4294901760, %v2025_v24 }
 0x102   :  { %772 = vmatpush.msrb.mxu1 %v1917_v36  ;;  %666 = vmatpush.msra.mxu3 %v665_v39  ;;  %v694_v12 = vsub.f32 %v1968_v60, %v693_v6  ;;  %v705_v39 = vand.u32 4294901760, %v704_v33 }
 0x103   :  { %738 = vmatpush.msrb.mxu0 %v1905_v30  ;;  %625 = vmatpush.msra.mxu2 %v1933_v38  ;;  %v714_v57 = vsub.f32 %v2025_v24, %v713_v47 }
 0x104   :  { %773 = vmatpush.msrb.mxu1 %v1933_v38  ;;  %671 = vmatpush.msra.mxu3 %v670_v42  ;;  %v695_v14 = vand.u32 4294901760, %v694_v12  ;;  %v709_v42 = vsub.f32 %v2008_v27, %v708_v37 }
 0x105   :  { %740 = vmatpush.msrb.mxu0 %v1915_v35  ;;  %626 = vmatpush.msra.mxu2 %v1947_v46  ;;  %v715_v10 = vand.u32 4294901760, %v714_v57  ;;  %v1643_v35 = vmov 5  }
 0x106   :  { %774 = vmatpush.msrb.mxu1 %v1947_v46  ;;  %676 = vmatpush.msra.mxu3 %v675_v48  ;;  %v2039_v48 = vld [vmem:[#allocation2 + $0x58] sm:$0xf]  ;;  %v710_v23 = vand.u32 4294901760, %v709_v42 }
 0x107   :  { %742 = vmatpush.msrb.mxu0 %v1931_v0  ;;  %627 = vmatpush.msra.mxu2 %v1954_v51 }
 0x108   :  { %775 = vmatpush.msrb.mxu1 %v1954_v51  ;;  %681 = vmatpush.msra.mxu3 %v680_v56  ;;  %v718_v56 = vand.u32 4294901760, %v2033_v40 }
 0x109   :  { %744 = vmatpush.msrb.mxu0 %v1944_v44  ;;  %628 = vmatpush.msra.mxu2 %v1970_v61 }
 0x10a   :  { %776 = vmatpush.msrb.mxu1 %v1970_v61  ;;  %686 = vmatpush.msra.mxu3 %v685_v3  ;;  %v719_v1 = vsub.f32 %v2033_v40, %v718_v56  ;;  %v429_v3 = vunpack.c.l.bf16 %v2039_v48 }
 0x10b   :  { %746 = vmatpush.msrb.mxu0 %v1960_v52  ;;  %629 = vmatpush.msra.mxu2 %v1981_v8  ;;  %v1645_v52 = vmov 2  }
 0x10c   :  { %777 = vmatpush.msrb.mxu1 %v1981_v8  ;;  %691 = vmatpush.msra.mxu3 %v690_v11  ;;  %v430_v55 = vperm.slane %v429_v3, 0  ;;  %v1649_v11 = vmov 7   ;;  %v616_v19 = vperm.slane %v429_v3, 1 }
 0x10d   :  { %748 = vmatpush.msrb.mxu0 %v1968_v60  ;;  %630 = vmatpush.msra.mxu2 %v1997_v59  ;;  %v1646_v60 = vmov 8  }
 0x10e   :  { %778 = vmatpush.msrb.mxu1 %v1997_v59  ;;  %696 = vmatpush.msra.mxu3 %v695_v14 }
 0x10f   :  { %750 = vmatpush.msrb.mxu0 %v1979_v7  ;;  %631 = vmatpush.msra.mxu2 %v2012_v28 }
 0x110   :  { %779 = vmatpush.msrb.mxu1 %v2012_v28  ;;  %701 = vmatpush.msra.mxu3 %v700_v29 }
 0x111   :  { %752 = vmatpush.msrb.mxu0 %v1995_v53  ;;  %632 = vmatpush.msra.mxu2 %v2019_v21  ;;  %v1648_v53 = vmov 6  }
 0x112   :  { %706 = vmatpush.msra.mxu3 %v705_v39  ;;  %780 = vmatpush.msrb.mxu1 %v2019_v21 }
 0x113   :  { %754 = vmatpush.msrb.mxu0 %v2008_v27  ;;  %790 = vmatpush.msrb.mxu2 %v643_v54  ;;  %v720_v54 = vand.u32 4294901760, %v719_v1  ;;  %v1473_v27 = vld [vmem:[#allocation2 + $0x10] sm:$0xff]  }
 0x114   :  { %711 = vmatpush.msra.mxu3 %v710_v23  ;;  %1510 = vset.pattern.permute.xlu0 %v1643_v35  ;;  %v866_v23 = vpop.permute.xlu0 %865 }
 0x115   :  { %756 = vmatpush.msrb.mxu0 %v2025_v24  ;;  %793 = vmatpush.msrb.mxu2 %v648_v63 }
 0x116   :  { %716 = vmatpush.msra.mxu3 %v715_v10  ;;  %900 = vperm.xlu0 %1510, %v1700_v2  }
 0x117   :  { %758 = vmatpush.msrb.mxu0 %v2033_v40  ;;  %796 = vmatpush.msrb.mxu2 %v653_v15 }
 0x118   :  { %721 = vmatpush.msra.mxu3 %v720_v54 }
 0x119   :  { %799 = vmatpush.msrb.mxu2 %v658_v22 }
 0x11a   :  { %841 = vmatpush.msrb.mxu3 %v1841_v49 }
 0x11b   :  { %802 = vmatpush.msrb.mxu2 %v663_v32 }
 0x11c   :  { %842 = vmatpush.msrb.mxu3 %v1847_v50 }
 0x11d   :  { %805 = vmatpush.msrb.mxu2 %v668_v34  ;;  %v1642_v34 = vmov 1  }
 0x11e   :  { %843 = vmatpush.msrb.mxu3 %v1856_v58  ;;  %1506 = vset.pattern.permute.xlu1 %v1642_v34  ;;  %v1424_v34 = vld [vmem:[#allocation5 + $0xe4] sm:$0xf] }
 0x11f   :  { %808 = vmatpush.msrb.mxu2 %v673_v16  ;;  %872 = vperm.xlu1 %1506, %v1700_v2   ;;  %v1644_v16 = vmov 3  }
 0x120   :  { %844 = vmatpush.msrb.mxu3 %v1869_v9  ;;  %1508 = vset.pattern.permute.xlu2 %v1644_v16 }
 0x121   :  { %811 = vmatpush.msrb.mxu2 %v678_v41  ;;  %886 = vperm.xlu2 %1508, %v1700_v2  }
 0x122   :  { %845 = vmatpush.msrb.mxu3 %v1884_v18  ;;  %1514 = vset.pattern.permute.xlu0 %v1646_v60 }
 0x123   :  { %814 = vmatpush.msrb.mxu2 %v683_v43 }
 0x124   :  { %846 = vmatpush.msrb.mxu3 %v1891_v25 }
 0x125   :  { %817 = vmatpush.msrb.mxu2 %v688_v62 }
 0x126   :  { %847 = vmatpush.msrb.mxu3 %v1907_v31 }
 0x127   :  { %820 = vmatpush.msrb.mxu2 %v693_v6  ;;  %1507 = vset.pattern.permute.xlu1 %v1645_v52  ;;  %v1647_v6 = vmov 4   ;;  %v1425_v52 = vld [vmem:[#allocation5 + $0xec] sm:$0xf] }
 0x128   :  { %848 = vmatpush.msrb.mxu3 %v1917_v36  ;;  %879 = vperm.xlu1 %1507, %v1700_v2  }
 0x129   :  { %823 = vmatpush.msrb.mxu2 %v698_v4  ;;  %1509 = vset.pattern.permute.xlu2 %v1647_v6 }
 0x12a   :  { %849 = vmatpush.msrb.mxu3 %v1933_v38  ;;  %893 = vperm.xlu2 %1509, %v1700_v2  }
 0x12b   :  { %826 = vmatpush.msrb.mxu2 %v703_v20 }
 0x12c   :  { %850 = vmatpush.msrb.mxu3 %v1947_v46 }
 0x12d   :  { %829 = vmatpush.msrb.mxu2 %v708_v37 }
 0x12e   :  { %851 = vmatpush.msrb.mxu3 %v1954_v51 }
 0x12f   :  { %832 = vmatpush.msrb.mxu2 %v713_v47 }
 0x130   :  { %852 = vmatpush.msrb.mxu3 %v1970_v61  ;;  %1511 = vset.pattern.permute.xlu1 %v1648_v53 }
 0x131   :  { %835 = vmatpush.msrb.mxu2 %v718_v56  ;;  %907 = vperm.xlu1 %1511, %v1700_v2  }
 0x132   :  { %853 = vmatpush.msrb.mxu3 %v1981_v8  ;;  %1512 = vset.pattern.permute.xlu2 %v1649_v11 }
 0x133   :  { %914 = vperm.xlu2 %1512, %v1700_v2  }
 0x134   :  { %854 = vmatpush.msrb.mxu3 %v1997_v59 }
 0x136   :  { %855 = vmatpush.msrb.mxu3 %v2012_v28 }
 0x138   :  { %856 = vmatpush.msrb.mxu3 %v2019_v21  ;;  %v2104_v21 = vunpack.c.l.bf16 %v1473_v27 }
 0x139   :  { %1513 = vset.pattern.permute.xlu1 %v1646_v60  ;;  %v1392_v60 = vld [vmem:[#allocation5 + $0xf8] sm:$0xf0] }
 0x13a   :  { %921 = vperm.xlu1 %1513, %v1700_v2   ;;  %v868_v47 = vperm.slane %v2104_v21, 0  ;;  %v875_v48 = vperm.slane %v2104_v21, 1  ;;  %v1395_v6 = vor.u32 %v1425_v52, %v1392_v60  ;;  %v1304_v52 = vld [vmem:[#allocation5 + $0x50] sm:$0xf0] }
 0x13c   :  { %v869_v10 = vmul.f32 %v868_v47, %v866_v23 }
 0x165   :  { %v494_v45 = vpop.f32.mrf.mxu1 }
 0x16d   :  { %v457_v12 = vpop.f32.mrf.mxu0  ;;  %v543_v5 = vpop.f32.mrf.mxu1 }
 0x16e   :  { %v458_v63 = vadd.f32 %v457_v12, %v430_v55  ;;  %v889_v12 = vperm.slane %v2104_v21, 3 }
 0x170   :  { %v495_v49 = vadd.f32 %v494_v45, %v458_v63  ;;  %v882_v45 = vperm.slane %v2104_v21, 2 }
 0x175   :  { %v520_v15 = vpop.f32.mrf.mxu0  ;;  %v593_v18 = vpop.f32.mrf.mxu1 }
 0x176   :  { %v521_v50 = vadd.f32 %v520_v15, %v495_v49  ;;  %v1439_v15 = vunpack.c.h.bf16 %v1473_v27 }
 0x178   :  { %v544_v58 = vadd.f32 %v543_v5, %v521_v50 }
 0x17b   :  { %v887_v20 = vpop.permute.xlu2 %886 }
 0x17d   :  { %v572_v9 = vpop.f32.mrf.mxu0 }
 0x17e   :  { %v573_v17 = vadd.f32 %v572_v9, %v544_v58  ;;  %v896_v58 = vperm.slane %v2104_v21, 4  ;;  %v903_v9 = vperm.slane %v2104_v21, 5 }
 0x180   :  { %v594_v22 = vadd.f32 %v593_v18, %v573_v17  ;;  %v890_v17 = vmul.f32 %v889_v12, %v887_v20 }
 0x182   :  { %v596_v25 = vsub.f32 0.0, %v594_v22 }
 0x184   :  { %v597_v26 = vmul.f32 1.442695, %v596_v25  ;;  %v894_v3 = vpop.permute.xlu2 %893  ;;  %v910_v25 = vperm.slane %v2104_v21, 6 }
 0x186   :  { %1517 = vpow2.f32 %v597_v26  ;;  %v917_v26 = vperm.slane %v2104_v21, 7  ;;  %v1418_v21 = vld [vmem:[#allocation5 + $0xac] sm:$0xf0] }
 0x188   :  { %v901_v18 = vpop.permute.xlu0 %900 }
 0x189   :  { %v904_v16 = vmul.f32 %v903_v9, %v901_v18  ;;  %v1410_v18 = vld [vmem:[#allocation5 + $0x6c] sm:$0xf0] }
 0x18c   :  { %v1518_v30 = vpop.eup %1517 }
 0x18d   :  { %v599_v31 = vadd.f32 1.0, %v1518_v30  ;;  %v924_v30 = vperm.slane %v1439_v15, 0  ;;  %v1415_v15 = vld [vmem:[#allocation5 + $0x94] sm:$0xf0] }
 0x18f   :  { %1519 = vrcp.f32 %v599_v31  ;;  %v611_v38 = vand.u32 2147483648, %v599_v31  ;;  %v609_v44 = vand.u32 2147483647, %v599_v31  ;;  %vm605_vm8 = vweird.f32 %v599_v31 }
 0x191   :  { %v612_v43 = vor.u32 1.1754944e-38, %v611_v38  ;;  %vm610_vm10 = vcmp.eq.f32.partialorder %v609_v44, 8.507059e+37  ;;  %v873_v14 = vpop.permute.xlu1 %872  ;;  %v1384_v38 = vld [vmem:[#allocation5 + $0xf0] sm:$0xf0]  ;;  %v1427_v44 = vld [vmem:[#allocation5 + $0xf4] sm:$0xf0] }
 0x192   :  { %v876_v63 = vmul.f32 %v875_v48, %v873_v14  ;;  %v1423_v14 = vld [vmem:[#allocation5 + $0xd4] sm:$0xf0]  ;;  %v1417_v48 = vld [vmem:[#allocation5 + $0xac] sm:$0xf] }
 0x195   :  { %v1520_v32 = vpop.eup %1519 }
 0x196   :  { %v601_v36 = vmul.f32 %v1520_v32, %v599_v31  ;;  %vm606_vm0 = vweird.f32 %v1520_v32  ;;  %v1382_v31 = vld [vmem:[#allocation5 + $0xe0] sm:$0xf] }
 0x197   :  { %vm607_vm9 = vmor %vm605_vm8, %vm606_vm0 }
 0x198   :  { %v602_v0 = vsub.f32 1.0, %v601_v36  ;;  %v897_v36 = vmul.f32 %v896_v58, %v894_v3 }
 0x19a   :  { %v603_v41 = vmul.f32 %v1520_v32, %v602_v0  ;;  %v880_v37 = vpop.permute.xlu1 %879 }
 0x19b   :  { %v883_v49 = vmul.f32 %v882_v45, %v880_v37  ;;  %v1350_v37 = vld [vmem:[#allocation5 + $0xa0] sm:$0xf]  ;;  %v1414_v45 = vld [vmem:[#allocation5 + $0x8c] sm:$0xf0] }
 0x19c   :  { %v604_v46 = vadd.f32 %v1520_v32, %v603_v41  ;;  %v1390_v41 = vld [vmem:[#allocation5 + $0xe8] sm:$0xf]  ;;  %v1351_v23 = vor.u32 %v1418_v21, %v1350_v37  ;;  %v1296_v37 = vld [vmem:[#allocation5 + $0x38] sm:$0xf0] }
 0x19e   :  { %v608_v51 = vsel %vm607_vm9, %v1520_v32, %v604_v46  ;;  %v1426_v32 = vld [vmem:[#allocation5 + $0xec] sm:$0xf0]  ;;  %v915_v46 = vpop.permute.xlu2 %914 }
 0x19f   :  { %v613_v61 = vsel %vm610_vm10, %v612_v43, %v608_v51  ;;  %v1383_v0 = vor.u32 %v1426_v32, %v1382_v31  ;;  %v1387_v43 = vor.u32 %v1424_v34, %v1384_v38  ;;  %v1391_v51 = vor.u32 %v1427_v44, %v1390_v41  ;;  %v1326_v31 = vld [vmem:[#allocation5 + $0x68] sm:$0xf]  ;;  %v1302_v41 = vld [vmem:[#allocation5 + $0x40] sm:$0xf] }
 0x1a0   :  { %v615_v62 = vmul.f32 %v613_v61, %v594_v22  ;;  %v1366_v61 = vld [vmem:[#allocation5 + $0xc0] sm:$0xf] }
 0x1a1   :  { %1171 = vmatpush.bf16.msra.mxu0 %v1383_v0  ;;  %1184 = vmatpush.bf16.msra.mxu1 %v1387_v43  ;;  %v1406_v43 = vld [vmem:[#allocation5 + $0x4c] sm:$0xf0] }
 0x1a2   :  { %v633_v7 = vand.u32 4294901760, %v615_v62 }
 0x1a3   :  { %v908_v55 = vpop.permute.xlu1 %907 }
 0x1a4   :  { %v634_v8 = vsub.f32 %v615_v62, %v633_v7  ;;  %723 = vmatmul.f32.vlgmr.msra.gmra.mxu3 %v633_v7  ;;  %v911_v20 = vmul.f32 %v910_v25, %v908_v55 }
 0x1a5   :  { %1210 = vmatpush.bf16.msra.mxu3 %v1395_v6  ;;  %v1407_v6 = vld [vmem:[#allocation5 + $0x54] sm:$0xf0] }
 0x1a6   :  { %761 = vmatmul.f32.vlgmr.msrb.gmra.mxu0 %v634_v8  ;;  %v635_v4 = vand.u32 4294901760, %v634_v8 }
 0x1a8   :  { %784 = vmatmul.f32.vlgmr.msrb.gmra.mxu1 %v635_v4  ;;  %v636_v59 = vsub.f32 %v634_v8, %v635_v4  ;;  %v1420_v8 = vld [vmem:[#allocation5 + $0xc4] sm:$0xf]  ;;  %v1368_v4 = vld [vmem:[#allocation5 + $0xd0] sm:$0xf0] }
 0x1a9   :  { %v1371_v11 = vor.u32 %v1420_v8, %v1368_v4  ;;  %v1312_v8 = vld [vmem:[#allocation5 + $0x58] sm:$0xf0] }
 0x1aa   :  { %v637_v13 = vand.u32 4294901760, %v636_v59 }
 0x1ab   :  { %1185 = vmatpush.bf16.msra.mxu1 %v1371_v11 }
 0x1ac   :  { %638 = vmatmul.f32.vlgmr.msra.gmra.mxu2 %v637_v13  ;;  %858 = vmatmul.f32.vlgmr.msrb.gmra.mxu3 %v633_v7  ;;  %v922_v53 = vpop.permute.xlu1 %921  ;;  %v1374_v13 = vld [vmem:[#allocation5 + $0xc8] sm:$0xf] }
 0x1ad   :  { %1197 = vmatpush.bf16.msra.mxu2 %v1391_v51  ;;  %v1404_v51 = vld [vmem:[#allocation5 + $0x44] sm:$0xf] }
 0x1b4   :  { %837 = vmatmul.f32.vlgmr.msrb.gmra.mxu2 %v633_v7  ;;  %v1422_v7 = vld [vmem:[#allocation5 + $0xcc] sm:$0xf0] }
 0x1b5   :  { %v1367_v59 = vor.u32 %v1422_v7, %v1366_v61  ;;  %v1405_v7 = vld [vmem:[#allocation5 + $0x4c] sm:$0xf] }
 0x1b7   :  { %1172 = vmatpush.bf16.msra.mxu0 %v1367_v59  ;;  %v1307_v59 = vor.u32 %v1404_v51, %v1304_v52 }
 0x1bb   :  { %1173 = vmatpush.bf16.msra.mxu0 %v1351_v23  ;;  %v1272_v23 = vld [vmem:[#allocation5 + $0x10] sm:$0xf0] }
 0x223   :  { %v762_v39 = vpop.f32.mrf.mxu0 }
 0x225   :  { %v785_v40 = vpop.f32.mrf.mxu1 }
 0x227   :  { %v724_v28 = vpop.f32.mrf.mxu3 }
 0x22f   :  { %v639_v29 = vpop.f32.mrf.mxu2  ;;  %v859_v1 = vpop.f32.mrf.mxu3 }
 0x230   :  { %v640_v33 = vadd.f32 %v639_v29, %v616_v19  ;;  %v1421_v19 = vld [vmem:[#allocation5 + $0xcc] sm:$0xf]  ;;  %v1375_v29 = vor.u32 %v1423_v14, %v1374_v13  ;;  %v1286_v13 = vld [vmem:[#allocation5 + $0x20] sm:$0xf]  ;;  %v1402_v14 = vld [vmem:[#allocation5 + $0x2c] sm:$0xf0] }
 0x231   :  { %v1287_v21 = vor.u32 %v1402_v14, %v1286_v13 }
 0x232   :  { %v725_v24 = vadd.f32 %v724_v28, %v640_v33  ;;  %v918_v28 = vmul.f32 %v917_v26, %v915_v46  ;;  %v1376_v33 = vld [vmem:[#allocation5 + $0xd8] sm:$0xf0]  ;;  %1198 = vmatpush.bf16.msra.mxu2 %v1375_v29  ;;  %v1408_v26 = vld [vmem:[#allocation5 + $0x64] sm:$0xf]  ;;  %v1403_v29 = vld [vmem:[#allocation5 + $0x34] sm:$0xf0] }
 0x234   :  { %v763_v42 = vadd.f32 %v762_v39, %v725_v24  ;;  %v1379_v24 = vor.u32 %v1421_v19, %v1376_v33  ;;  %v1416_v39 = vld [vmem:[#allocation5 + $0xa4] sm:$0xf]  ;;  %v1401_v33 = vld [vmem:[#allocation5 + $0x2c] sm:$0xf] }
 0x235   :  { %v1400_v19 = vld [vmem:[#allocation5 + $0x24] sm:$0xf] }
 0x236   :  { %v786_v2 = vadd.f32 %v785_v40, %v763_v42  ;;  %v1352_v42 = vld [vmem:[#allocation5 + $0xb0] sm:$0xf0]  ;;  %v1358_v40 = vld [vmem:[#allocation5 + $0xa8] sm:$0xf]  ;;  %1211 = vmatpush.bf16.msra.mxu3 %v1379_v24 }
 0x237   :  { %v838_v56 = vpop.f32.mrf.mxu2 }
 0x238   :  { %v839_v57 = vadd.f32 %v838_v56, %v786_v2  ;;  %v925_v2 = vmul.f32 %v924_v30, %v922_v53  ;;  %v1419_v56 = vld [vmem:[#allocation5 + $0xb4] sm:$0xf0]  ;;  %v1320_v30 = vld [vmem:[#allocation5 + $0x70] sm:$0xf0]  ;;  %v1303_v53 = vor.u32 %v1406_v43, %v1302_v41 }
 0x239   :  { %v1359_v3 = vor.u32 %v1419_v56, %v1358_v40  ;;  %v1323_v44 = vor.u32 %v1408_v26, %v1320_v30  ;;  %v1398_v40 = vld [vmem:[#allocation5 + $0xc] sm:$0xf0]  ;;  %v1278_v56 = vld [vmem:[#allocation5 + $0x8] sm:$0xf] }
 0x23a   :  { %v860_v54 = vadd.f32 %v859_v1, %v839_v57  ;;  %v1360_v57 = vld [vmem:[#allocation5 + $0xb8] sm:$0xf0]  ;;  %v1355_v1 = vor.u32 %v1416_v39, %v1352_v42  ;;  %v1270_v42 = vld [vmem:[#allocation5] sm:$0xf] }
 0x23b   :  { %v1363_v55 = vor.u32 %v1417_v48, %v1360_v57  ;;  %1199 = vmatpush.bf16.msra.mxu2 %v1359_v3  ;;  %v1399_v48 = vld [vmem:[#allocation5 + $0x14] sm:$0xf0]  ;;  %v1397_v57 = vld [vmem:[#allocation5 + $0xc] sm:$0xf] }
 0x23c   :  { %v870_v5 = vadd.f32 %v869_v10, %v860_v54  ;;  %v1334_v10 = vld [vmem:[#allocation5 + $0x80] sm:$0xf]  ;;  %v1412_v54 = vld [vmem:[#allocation5 + $0x84] sm:$0xf]  ;;  %1186 = vmatpush.bf16.msra.mxu1 %v1355_v1  ;;  %v1280_v1 = vld [vmem:[#allocation5 + $0x18] sm:$0xf0] }
 0x23d   :  { %v1335_v9 = vor.u32 %v1414_v45, %v1334_v10  ;;  %1212 = vmatpush.bf16.msra.mxu3 %v1363_v55  ;;  %v1271_v10 = vor.u32 %v1398_v40, %v1270_v42  ;;  %v1283_v55 = vor.u32 %v1397_v57, %v1280_v1 }
 0x23e   :  { %v877_v50 = vadd.f32 %v876_v63, %v870_v5  ;;  %v1336_v63 = vld [vmem:[#allocation5 + $0x90] sm:$0xf0]  ;;  %v1342_v5 = vld [vmem:[#allocation5 + $0x88] sm:$0xf] }
 0x23f   :  { %v1343_v25 = vor.u32 %v1415_v15, %v1342_v5  ;;  %1174 = vmatpush.bf16.msra.mxu0 %v1335_v9 }
 0x240   :  { %v884_v22 = vadd.f32 %v883_v49, %v877_v50  ;;  %v1413_v49 = vld [vmem:[#allocation5 + $0x8c] sm:$0xf]  ;;  %v1344_v50 = vld [vmem:[#allocation5 + $0x98] sm:$0xf0] }
 0x241   :  { %v1347_v34 = vor.u32 %v1413_v49, %v1344_v50  ;;  %1200 = vmatpush.bf16.msra.mxu2 %v1343_v25 }
 0x242   :  { %v891_v35 = vadd.f32 %v890_v17, %v884_v22  ;;  %v1318_v17 = vld [vmem:[#allocation5 + $0x60] sm:$0xf]  ;;  %v1339_v22 = vor.u32 %v1412_v54, %v1336_v63 }
 0x243   :  { %v1319_v38 = vor.u32 %v1410_v18, %v1318_v17  ;;  %1213 = vmatpush.bf16.msra.mxu3 %v1347_v34 }
 0x244   :  { %v898_v62 = vadd.f32 %v897_v36, %v891_v35  ;;  %v1411_v35 = vld [vmem:[#allocation5 + $0x74] sm:$0xf0]  ;;  %v1409_v36 = vld [vmem:[#allocation5 + $0x6c] sm:$0xf]  ;;  %1187 = vmatpush.bf16.msra.mxu1 %v1339_v22 }
 0x245   :  { %v1327_v46 = vor.u32 %v1411_v35, %v1326_v31  ;;  %1175 = vmatpush.bf16.msra.mxu0 %v1319_v38 }
 0x246   :  { %v905_v27 = vadd.f32 %v904_v16, %v898_v62  ;;  %v1328_v16 = vld [vmem:[#allocation5 + $0x78] sm:$0xf0]  ;;  %v1310_v62 = vld [vmem:[#allocation5 + $0x48] sm:$0xf] }
 0x247   :  { %v1331_v61 = vor.u32 %v1409_v36, %v1328_v16  ;;  %1201 = vmatpush.bf16.msra.mxu2 %v1327_v46  ;;  %v1311_v11 = vor.u32 %v1407_v6, %v1310_v62 }
 0x248   :  { %v912_v47 = vadd.f32 %v911_v20, %v905_v27  ;;  %1188 = vmatpush.bf16.msra.mxu1 %v1323_v44  ;;  %v1315_v20 = vor.u32 %v1405_v7, %v1312_v8  ;;  %v1288_v27 = vld [vmem:[#allocation5 + $0x30] sm:$0xf0] }
 0x249   :  { %1214 = vmatpush.bf16.msra.mxu3 %v1331_v61  ;;  %1176 = vmatpush.bf16.msra.mxu0 %v1303_v53  ;;  %v1291_v24 = vor.u32 %v1400_v19, %v1288_v27 }
 0x24a   :  { %v919_v12 = vadd.f32 %v918_v28, %v912_v47  ;;  %v1294_v28 = vld [vmem:[#allocation5 + $0x28] sm:$0xf]  ;;  %v1396_v47 = vld [vmem:[#allocation5 + $0x4] sm:$0xf] }
 0x24b   :  { %1202 = vmatpush.bf16.msra.mxu2 %v1311_v11  ;;  %v1295_v39 = vor.u32 %v1403_v29, %v1294_v28  ;;  %v1275_v54 = vor.u32 %v1396_v47, %v1272_v23 }
 0x24c   :  { %v2114_v58 = vadd.f32 %v925_v2, %v919_v12  ;;  %1189 = vmatpush.bf16.msra.mxu1 %v1307_v59  ;;  %v1299_v2 = vor.u32 %v1401_v33, %v1296_v37  ;;  %v1279_v12 = vor.u32 %v1399_v48, %v1278_v56 }
 0x24d   :  { %1215 = vmatpush.bf16.msra.mxu3 %v1315_v20  ;;  %1177 = vmatpush.bf16.msra.mxu0 %v1287_v21 }
 0x24e   :  { %v2117_v32 = vmul.f32 0.70710677, %v2114_v58  ;;  %927 = vst [vmem:[#allocation7] sm:$0xff] %v2114_v58  ;;  %v965_v61 = vmul.f32 0.5, %v2114_v58  ;;  %v1001_v58 = vld [vmem:[%s2141_s4] sm:$0xf] }
 0x24f   :  { %1203 = vmatpush.bf16.msra.mxu2 %v1295_v39  ;;  %1237 = dma.vmem_to_hbm [thread:$0]  %s1233_s1, 128, %s1235_s15, [#allocation4]   ;;  %v1004_v7 = vperm.slane %v1001_v58, 1  ;;  %v1005_v11 = vperm.slane %v1001_v58, 2  ;;  %v1006_v13 = vperm.slane %v1001_v58, 3 }
 0x250   :  { %v2121_v0 = vand.u32 2147483647, %v2117_v32  ;;  %1190 = vmatpush.bf16.msra.mxu1 %v1291_v24  ;;  %vm962_vm15 = vcmp.ge.f32.partialorder %v2117_v32, 0.0  ;;  %v1003_v32 = vperm.slane %v1001_v58, 0 }
 0x251   :  { %1216 = vmatpush.bf16.msra.mxu3 %v1299_v2  ;;  %1178 = vmatpush.bf16.msra.mxu0 %v1271_v10 }
 0x252   :  { %v930_v60 = vmul.f32 0.3275911, %v2121_v0  ;;  %v956_v18 = vsub.f32 0.0, %v2121_v0 }
 0x253   :  { %1204 = vmatpush.bf16.msra.mxu2 %v1279_v12 }
 0x254   :  { %v931_v4 = vadd.f32 1.0, %v930_v60  ;;  %1191 = vmatpush.bf16.msra.mxu1 %v1275_v54  ;;  %v957_v30 = vmul.f32 %v956_v18, %v2121_v0 }
 0x255   :  { %1217 = vmatpush.bf16.msra.mxu3 %v1283_v55 }
 0x256   :  { %1521 = vrcp.f32 %v931_v4  ;;  %v943_v5 = vand.u32 2147483648, %v931_v4  ;;  %v941_v49 = vand.u32 2147483647, %v931_v4  ;;  %vm937_vm12 = vweird.f32 %v931_v4 }
 0x257   :  { %v958_v35 = vmul.f32 1.442695, %v957_v30 }
 0x258   :  { %v944_v9 = vor.u32 1.1754944e-38, %v943_v5  ;;  %vm942_vm14 = vcmp.eq.f32.partialorder %v941_v49, 8.507059e+37 }
 0x259   :  { %1523 = vpow2.f32 %v958_v35 }
 0x25c   :  { %v1522_v3 = vpop.eup %1521 }
 0x25d   :  { %v933_v45 = vmul.f32 %v1522_v3, %v931_v4  ;;  %vm938_vm11 = vweird.f32 %v1522_v3 }
 0x25e   :  { %vm939_vm13 = vmor %vm937_vm12, %vm938_vm11 }
 0x25f   :  { %v934_v63 = vsub.f32 1.0, %v933_v45  ;;  %v1524_v46 = vpop.eup %1523 }
 0x261   :  { %v935_v15 = vmul.f32 %v1522_v3, %v934_v63 }
 0x263   :  { %v936_v50 = vadd.f32 %v1522_v3, %v935_v15 }
 0x265   :  { %v940_v17 = vsel %vm939_vm13, %v1522_v3, %v936_v50 }
 0x266   :  { %v945_v22 = vsel %vm942_vm14, %v944_v9, %v940_v17 }
 0x267   :  { %v947_v25 = vmul.f32 1.0614054, %v945_v22 }
 0x269   :  { %v948_v26 = vadd.f32 -1.4531521, %v947_v25 }
 0x26b   :  { %v949_v31 = vmul.f32 %v948_v26, %v945_v22 }
 0x26d   :  { %v950_v34 = vadd.f32 1.4214138, %v949_v31 }
 0x26f   :  { %v951_v36 = vmul.f32 %v950_v34, %v945_v22 }
 0x271   :  { %v952_v16 = vadd.f32 -0.28449672, %v951_v36 }
 0x273   :  { %v953_v38 = vmul.f32 %v952_v16, %v945_v22 }
 0x275   :  { %v954_v41 = vadd.f32 0.2548296, %v953_v38 }
 0x277   :  { %v955_v44 = vmul.f32 %v954_v41, %v945_v22 }
 0x279   :  { %v960_v43 = vmul.f32 %v1524_v46, %v955_v44 }
 0x27b   :  { %v961_v51 = vsub.f32 1.0, %v960_v43 }
 0x27d   :  { %v963_v52 = vsub.f32 0.0, %v961_v51 }
 0x27f   :  { %v964_v60 = vsel %vm962_vm15, %v961_v51, %v963_v52 }
 0x280   :  { %v966_v62 = vadd.f32 1.0, %v964_v60 }
 0x282   :  { %v967_v0 = vmul.f32 %v966_v62, %v965_v61 }
 0x284   :  { %v968_v6 = vpack.c.bf16 %v967_v0, %v967_v0 }
 0x286   :  { %1179 = vmatmul.bf16.vlgmr.msra.gmra.mxu0 %v968_v6  ;;  %1192 = vmatmul.bf16.vlgmr.msra.gmra.mxu1 %v968_v6 }
 0x287   :  { %1205 = vmatmul.bf16.vlgmr.msra.gmra.mxu2 %v968_v6  ;;  %1218 = vmatmul.bf16.vlgmr.msra.gmra.mxu3 %v968_v6 }
 0x303   :  { %v1180_v8 = vpop.f32.mrf.mxu0  ;;  %v1193_v4 = vpop.f32.mrf.mxu1 }
 0x304   :  { %v1181_v53 = vadd.f32 %v1180_v8, %v1003_v32  ;;  %v1194_v59 = vadd.f32 %v1193_v4, %v1004_v7 }
 0x306   :  { %1223 = vst [vmem:[#allocation8] sm:$0xff] %v1181_v53 }
 0x307   :  { %1224 = vst [vmem:[#allocation8 + $0x8] sm:$0xff] %v1194_v59 }
 0x30a   :  { %v1206_v14 = vpop.f32.mrf.mxu2  ;;  %v1219_v19 = vpop.f32.mrf.mxu3 }
 0x30b   :  { %v1207_v20 = vadd.f32 %v1206_v14, %v1005_v11  ;;  %v1220_v27 = vadd.f32 %v1219_v19, %v1006_v13  ;;  %v1182_v28 = vpop.f32.mrf.mxu0  ;;  %v1195_v29 = vpop.f32.mrf.mxu1 }
 0x30d   :  { %1225 = vst [vmem:[#allocation8 + $0x10] sm:$0xff] %v1207_v20 }
 0x30e   :  { %1226 = vst [vmem:[#allocation8 + $0x18] sm:$0xff] %v1220_v27 }
 0x30f   :  { %1248 = dma.vmem_to_hbm [thread:$0]  %s1244_s19, 512, %s1246_s21, [#allocation9]  }
 0x312   :  { %v1208_v33 = vpop.f32.mrf.mxu2  ;;  %v1221_v37 = vpop.f32.mrf.mxu3 }
 0x313   :  { %1625 = dma.done.wait [#allocation4], 128  }
 0x314   :  { %1626 = vsyncadd [#allocation4], 4294967168 }
 0x315   :  { %1627 = dma.done.wait [#allocation9], 512  }
 0x316   :  { %1628 = vsyncadd [#allocation9], 4294966784 }
 0x317   :  { %1257 = vsyncpa [#allocation3], 1 }
 0x318   :  { %1258 = vsyncpa [#allocation6], 1 }
 0x319   :  { %1259 = vsyncpa [#allocation4], 1 }
 0x31a   :  { %1260 = vsyncpa [#allocation9], 1 }

</bundles_post_ra>
